<compile_context>
chip_gen: v7x
topology: tpu7x:2x2x1
jax: 0.10.0
libtpu: 0.0.40
codegen_flags: <defaults>
</compile_context>

<pallas_src>
import jax
import jax.numpy as jnp
from jax.experimental import pallas as pl
from jax.experimental.pallas import tpu as pltpu

_TILE_BYTES_TARGET = 4 * 1024 * 1024   # per input tile (Pallas double-buffers it)
_VMEM_LIMIT_BYTES = 32 * 1024 * 1024   # fits v5e/v6e (128 MiB) and v7x (64 MiB)


def _max_readout_kernel(seq_ref, out_ref):
    # seq_ref: (B, tn, tf) input tile
    # out_ref: (B, tf) output block, resident across the reduction (last) grid axis
    j = pl.program_id(1)  # reduction axis

    # Per-tile reduce over the sequence axis (XLU sublane reduce; kernel is
    # HBM-bound so this is hidden under the DMA), then a running max.
    tile_max = jnp.max(seq_ref[...], axis=1)

    @pl.when(j == 0)
    def _():
        out_ref[...] = tile_max

    @pl.when(j > 0)
    def _():
        out_ref[...] = jnp.maximum(out_ref[...], tile_max)


def _sublane_multiple(dtype):
    bits = jnp.dtype(dtype).itemsize * 8
    return max(8, 256 // bits)  # f32 -> 8, bf16 -> 16, int8 -> 32


def _pick_tf(F):
    """Lane-dense feature tile: multiple of 128 that divides F, preferring >=2
    blocks so the v7x second TensorCore gets work on the parallel axis."""
    if F % 128 != 0:
        # TODO(synk): for F < 128 (or non-multiples) fold/pad in the wrapper so the
        # output store is a full-lane vst; full-extent F is correct but lane-sparse.
        return F
    for cand in (512, 256, 128):
        if F % cand == 0 and F // cand >= 2:
            return cand
    return F if F <= 512 else 128


def _pick_tn(N, B, tf, itemsize, sub):
    """Largest sublane-aligned divisor of N whose (B, tn, tf) tile fits the budget."""
    if N % sub != 0:
        return N  # full-extent fallback keeps the block legal for any dtype
    cap = (_TILE_BYTES_TARGET // max(1, B * tf * itemsize)) // sub * sub
    cap = max(sub, min(cap, N))
    for tn in range(cap, sub - 1, -sub):
        if N % tn == 0:
            return tn
    return N


def max_readout(seq: jax.Array, *, tn: int | None = None, tf: int | None = None) -> jax.Array:
    """Max over axis 1 of a (B, N, F) array, computed in a Pallas TPU kernel."""
    B, N, F = seq.shape
    itemsize = jnp.dtype(seq.dtype).itemsize
    sub = _sublane_multiple(seq.dtype)

    if tf is None:
        tf = _pick_tf(F)
    if tn is None:
        tn = _pick_tn(N, B, tf, itemsize, sub)
    assert F % tf == 0, "tf must divide F"
    assert N % tn == 0, "tn must divide N"

    grid = (F // tf, N // tn)  # (parallel features, reduction over sequence last)

    return pl.pallas_call(
        _max_readout_kernel,
        out_shape=jax.ShapeDtypeStruct((B, F), seq.dtype),
        grid_spec=pl.GridSpec(
            grid=grid,
            in_specs=[pl.BlockSpec((B, tn, tf), lambda f, j: (0, j, f))],
            out_specs=pl.BlockSpec((B, tf), lambda f, j: (0, f)),
        ),
        compiler_params=pltpu.CompilerParams(
            dimension_semantics=("parallel", "arbitrary"),
            vmem_limit_bytes=_VMEM_LIMIT_BYTES,
        ),
    )(seq)


if __name__ == "__main__":
    key = jax.random.PRNGKey(0)

    # Primary small test, same shape family as the module: batch=2, nodes=16, hidden=32.
    B, N, F = 2, 16, 32
    seq = jax.random.normal(key, (B, N, F), dtype=jnp.float32)
    out = jax.block_until_ready(max_readout(seq))
    ref = jnp.max(seq, axis=1)
    assert out.shape == (B, F)
    assert jnp.allclose(out, ref), "Pallas max-readout mismatch vs reference (small)"

    # Secondary test: lane-dense F tiling (tf=128, 2 parallel blocks) and a forced
    # multi-step reduction (tn=8 -> 8 grid steps) to exercise the accumulator path.
    B2, N2, F2 = 2, 64, 256
    seq2 = jax.random.normal(jax.random.PRNGKey(1), (B2, N2, F2), dtype=jnp.float32)
    out2 = jax.block_until_ready(max_readout(seq2, tn=8))
    ref2 = jnp.max(seq2, axis=1)
    assert jnp.allclose(out2, ref2), "Pallas max-readout mismatch vs reference (tiled)"

    print("KERNEL_OK")
</pallas_src>

<mosaic_0001>
module attributes {stable_mosaic.version = 11 : i64} {
  func.func @_max_readout_kernel(%arg0: i32, %arg1: i32, %arg2: memref<2x16x32xf32, #tpu.memory_space<vmem>>, %arg3: memref<2x32xf32, #tpu.memory_space<vmem>>) attributes {dimension_semantics = [#tpu.dimension_semantics<parallel>, #tpu.dimension_semantics<arbitrary>], iteration_bounds = array<i64: 1, 1>, scalar_prefetch = 0 : i64, scratch_operands = 0 : i64, tpu.core_type = #tpu.core_type<tc>, window_params = [{transform_indices = @transform_0, window_bounds = array<i64: 2, 16, 32>}, {transform_indices = @transform_1, window_bounds = array<i64: 2, 32>}]} {
    %c0 = arith.constant 0 : index
    %c0_0 = arith.constant 0 : index
    %c0_1 = arith.constant 0 : index
    %0 = vector.load %arg2[%c0, %c0_0, %c0_1] : memref<2x16x32xf32, #tpu.memory_space<vmem>>, vector<2x16x32xf32>
    %cst = arith.constant dense<0xFF800000> : vector<2x32xf32>
    %1 = vector.multi_reduction <maximumf>, %0, %cst [1] : vector<2x16x32xf32> to vector<2x32xf32>
    %c0_i32 = arith.constant 0 : i32
    %2 = arith.cmpi eq, %arg1, %c0_i32 : i32
    %3 = arith.extui %2 : i1 to i32
    %c0_i32_2 = arith.constant 0 : i32
    %4 = arith.cmpi ne, %3, %c0_i32_2 : i32
    scf.if %4 {
      %c0_5 = arith.constant 0 : index
      %c0_6 = arith.constant 0 : index
      %8 = vector.load %arg3[%c0_5, %c0_6] : memref<2x32xf32, #tpu.memory_space<vmem>>, vector<2x32xf32>
      tpu.vector_store %arg3[%c0_5, %c0_6], %1 {strides = array<i32>} : memref<2x32xf32, #tpu.memory_space<vmem>>, vector<2x32xf32>,
    } else {
    }
    %c0_i32_3 = arith.constant 0 : i32
    %5 = arith.cmpi sgt, %arg1, %c0_i32_3 : i32
    %6 = arith.extui %5 : i1 to i32
    %c0_i32_4 = arith.constant 0 : i32
    %7 = arith.cmpi ne, %6, %c0_i32_4 : i32
    scf.if %7 {
      %c0_5 = arith.constant 0 : index
      %c0_6 = arith.constant 0 : index
      %8 = vector.load %arg3[%c0_5, %c0_6] : memref<2x32xf32, #tpu.memory_space<vmem>>, vector<2x32xf32>
      %9 = arith.maximumf %8, %1 : vector<2x32xf32>
      %c0_7 = arith.constant 0 : index
      %c0_8 = arith.constant 0 : index
      %10 = vector.load %arg3[%c0_7, %c0_8] : memref<2x32xf32, #tpu.memory_space<vmem>>, vector<2x32xf32>
      tpu.vector_store %arg3[%c0_7, %c0_8], %9 {strides = array<i32>} : memref<2x32xf32, #tpu.memory_space<vmem>>, vector<2x32xf32>,
    } else {
    }
    return
  }
  func.func @transform_0(%arg0: i32, %arg1: i32) -> (i32, i32, i32) {
    %c0_i32 = arith.constant 0 : i32
    %c0_i32_0 = arith.constant 0 : i32
    return %c0_i32, %arg1, %arg0 : i32, i32, i32
  }
  func.func @transform_1(%arg0: i32, %arg1: i32) -> (i32, i32) {
    %c0_i32 = arith.constant 0 : i32
    %c0_i32_0 = arith.constant 0 : i32
    return %c0_i32, %arg0 : i32, i32
  }
}

</mosaic_0001>

<bundles_post_ra>
// kernel: tpu_custom_call.1
= control target key start
LH: loop header
LB: loop body
LE: loop exit
PB: predicated region body
PF: predicated region fallthrough
CT: control target
= control target key end

     0   :  { %6 = vsyncpa [#allocation3], 0  ;;  %s175_s0 = inlined_call_operand.hbm [shape: f32[2,16,32], index: 0, kind: input, shape index: {}]   ;;  %s176_s1 = inlined_call_operand.hbm [shape: f32[2,32], index: 1, kind: output, shape index: {}]  }
   0x1   :  { %7 = vsyncpa [#allocation4], 0  ;;  %s137_s6 = smov [#allocation2]   ;;  %s89_s10 = scalar_lea.hbm %s175_s0, 512 }
   0x2   :  { %s13_s7 = sshll.u32 %s137_s6, 4  ;;  %p90_p0 = scmp.ne.s32.totalorder %s175_s0, %s89_s10  ;;  %s14_s7 = int_to_ptr.vmem [resolvable:$true] %s13_s7 }
   0x3   :  { %p93_p1 = scmp.lt.u32.totalorder %s89_s10, %s175_s0 }
   0x5   :  { %p95_p2 = pnand %p93_p1, %p90_p0 }
   0x7   :  { %98 = shalt.err (!%p95_p2)
}
   0x8   :  { %s99_s15 = scalar_lea.vmem %s14_s7, 512  ;;  %p104_p4 = scmp.lt.s32.totalorder %s14_s7, %s14_s7 }
   0x9   :  { %p100_p3 = scmp.ne.s32.totalorder %s14_s7, %s99_s15  ;;  %p105_p5 = scmp.lt.s32.totalorder %s99_s15, %s99_s15 }
   0xb   :  { %p106_p6 = por %p105_p5, %p104_p4 }
   0xd   :  { %p107_p7 = pnand %p106_p6, %p100_p3 }
   0xf   :  { %110 = shalt.err (!%p107_p7)
}
  0x10   :  { %s138_s16 = smov 128   ;;  %s139_s17 = smov 8  }
  0x11   :  { %19 = dma.hbm_to_vmem [thread:$0]  %s175_s0, 512, %s14_s7, [#allocation3], %s138_s16, %s138_s16, %s139_s17  }
  0x12   :  { %133 = dma.done.wait [#allocation3], 512  }
  0x13   :  { %134 = vsyncadd [#allocation3], 4294966784  ;;  %vm27_vm0 = vcmask 261120   ;;  %v23_v0 = vld [vmem:[#allocation2] sm:$0xff]  ;;  %v24_v1 = vld [vmem:[#allocation2 + $0x8] sm:$0xff]  ;;  %s140_s0 = smov [#allocation5]  }
  0x14   :  { %v25_v2 = vld [vmem:[#allocation2 + $0x10] sm:$0xff]  ;;  %v26_v3 = vld [vmem:[#allocation2 + $0x18] sm:$0xff]  ;;  %v28_v4 = vsel %vm27_vm0, %v23_v0, -inf  ;;  %v29_v5 = vsel %vm27_vm0, %v24_v1, -inf  ;;  %s76_s20 = sshll.u32 %s140_s0, 4  ;;  %vm52_vm1 = vcmask 1041409   ;;  %s77_s20 = int_to_ptr.vmem [resolvable:$true] %s76_s20 }
  0x15   :  { %v37_v6 = vsel %vm27_vm0, %v25_v2, -inf  ;;  %v30_v7 = vmax.f32 %v28_v4, %v29_v5  ;;  %v38_v8 = vsel %vm27_vm0, %v26_v3, -inf  ;;  %vm55_vm2 = vcmask 254976   ;;  %s111_s21 = scalar_lea.vmem %s77_s20, 32  ;;  %p116_p9 = scmp.lt.s32.totalorder %s77_s20, %s77_s20 }
  0x16   :  { %v39_v9 = vmax.f32 %v37_v6, %v38_v8  ;;  %p112_p8 = scmp.ne.s32.totalorder %s77_s20, %s111_s21  ;;  %p117_p10 = scmp.lt.s32.totalorder %s111_s21, %s111_s21 }
  0x17   :  { %v31_v10 = vrot.slane %v30_v7, 4 }
  0x18   :  { %v40_v11 = vrot.slane %v39_v9, 4  ;;  %p118_p11 = por %p117_p10, %p116_p9 }
  0x19   :  { %v32_v12 = vmax.f32 %v30_v7, %v31_v10 }
  0x1a   :  { %v41_v13 = vmax.f32 %v39_v9, %v40_v11  ;;  %p119_p12 = pnand %p118_p11, %p112_p8 }
  0x1b   :  { %v33_v14 = vrot.slane %v32_v12, 2 }
  0x1c   :  { %v42_v15 = vrot.slane %v41_v13, 2 }
  0x1d   :  { %v34_v16 = vmax.f32 %v32_v12, %v33_v14 }
  0x1e   :  { %v43_v17 = vmax.f32 %v41_v13, %v42_v15 }
  0x1f   :  { %v35_v18 = vrot.slane %v34_v16, 1 }
  0x20   :  { %v44_v19 = vrot.slane %v43_v17, 1 }
  0x21   :  { %v36_v20 = vmax.f32 %v34_v16, %v35_v18 }
  0x22   :  { %v45_v21 = vmax.f32 %v43_v17, %v44_v19 }
  0x24   :  { %v53_v22 = vsel %vm52_vm1, %v45_v21, %v36_v20 }
  0x25   :  { %56 = vst.msk [vmem:[#allocation5] sm:$0x3] %vm55_vm2, %v53_v22 }
  0x26   :  { %122 = shalt.err (!%p119_p12)
}
  0x27   :  { %s123_s24 = scalar_lea.hbm %s176_s1, 32 }
  0x28   :  { %p124_p13 = scmp.ne.s32.totalorder %s176_s1, %s123_s24  ;;  %p127_p0 = scmp.lt.u32.totalorder %s123_s24, %s176_s1 }
  0x2a   :  { %p129_p1 = pnand %p127_p0, %p124_p13 }
  0x2c   :  { %132 = shalt.err (!%p129_p1)
}
  0x2d   :  { %79 = dma.vmem_to_hbm [thread:$0]  %s77_s20, 32, %s176_s1, [#allocation4]  }
  0x2e   :  { %135 = dma.done.wait [#allocation4], 32  }
  0x2f   :  { %136 = vsyncadd [#allocation4], 4294967264 }
  0x30   :  { %83 = vsyncpa [#allocation3], 1 }
  0x31   :  { %84 = vsyncpa [#allocation4], 1 }

</bundles_post_ra>
